<compile_context>
chip_gen: v7x
topology: tpu7x:2x2x1
jax: 0.10.0
libtpu: 0.0.40
codegen_flags: <defaults>
</compile_context>

<pallas_src>
import math

import jax
import jax.numpy as jnp
from jax.experimental import pallas as pl
from jax.experimental.pallas import tpu as pltpu


# ----------------------------------------------------------------------------
# Kernels
# ----------------------------------------------------------------------------

def _attention_kernel(lstm_ref, hid_ref, out_ref):
    """Single-pass kernel: a full (TB, S, H) slab fits the VMEM budget.

    lstm_ref : (TB, S, H)  LSTM outputs for TB batch rows
    hid_ref  : (TB, H)     final hidden state for the same rows
    out_ref  : (TB, H)     attention-weighted hidden state
    """
    lstm = lstm_ref[...].astype(jnp.float32)                  # (TB, S, H)
    hid = hid_ref[...].astype(jnp.float32)                    # (TB, H)

    # scores[b, s] = sum_h lstm[b, s, h] * hid[b, h]
    # VPU broadcast-multiply + XLU lane reduce (stays in native layout).
    scores = jnp.sum(lstm * hid[:, None, :], axis=-1)         # (TB, S)

    # Numerically-stable softmax over S; exact divide (kernel is DMA-bound).
    m = jnp.max(scores, axis=-1, keepdims=True)               # (TB, 1)
    e = jnp.exp(scores - m)                                   # (TB, S)
    w = e / jnp.sum(e, axis=-1, keepdims=True)                # (TB, S)

    # new_hidden[b, h] = sum_s w[b, s] * lstm[b, s, h]  (sublane reduce)
    out_ref[...] = jnp.sum(w[:, :, None] * lstm, axis=1).astype(out_ref.dtype)


def _attention_kernel_s_tiled(lstm_ref, hid_ref, out_ref, m_sc, l_sc, acc_sc):
    """Online-softmax kernel for large S*H (grid = (B//TB, S//TS)).

    The S axis is a resident reduction ("arbitrary"): the output block is the
    same for every s step, and m/l/acc scratch carries the running softmax.

    lstm_ref : (TB, TS, H)
    hid_ref  : (TB, H)
    out_ref  : (TB, H)
    """
    s_idx = pl.program_id(1)

    @pl.when(s_idx == 0)
    def _():
        m_sc[...] = jnp.full_like(m_sc, -jnp.inf)
        l_sc[...] = jnp.zeros_like(l_sc)
        acc_sc[...] = jnp.zeros_like(acc_sc)

    lstm = lstm_ref[...].astype(jnp.float32)                  # (TB, TS, H)
    hid = hid_ref[...].astype(jnp.float32)                    # (TB, H)

    scores = jnp.sum(lstm * hid[:, None, :], axis=-1)         # (TB, TS)

    m_new = jnp.maximum(m_sc[...], jnp.max(scores, axis=-1, keepdims=True))
    alpha = jnp.exp(m_sc[...] - m_new)                        # (TB, 1)
    p = jnp.exp(scores - m_new)                               # (TB, TS)
    l_sc[...] = alpha * l_sc[...] + jnp.sum(p, axis=-1, keepdims=True)
    acc_sc[...] = alpha * acc_sc[...] + jnp.sum(p[:, :, None] * lstm, axis=1)
    m_sc[...] = m_new

    @pl.when(s_idx == pl.num_programs(1) - 1)
    def _():
        out_ref[...] = (acc_sc[...] / l_sc[...]).astype(out_ref.dtype)


# ----------------------------------------------------------------------------
# Tile selection (VMEM-aware)
# ----------------------------------------------------------------------------

def _vmem_budgets():
    """(tile_budget, vmem_limit) in bytes, derived from the chip's VMEM."""
    try:
        cap = int(pltpu.get_tpu_info().vmem_capacity_bytes)
    except Exception:
        cap = 64 * 1024 * 1024  # conservative: v7x per-TensorCore VMEM
    tile_budget = cap * 3 // 4   # ~48 MiB on v7x, ~96 MiB on v5e/v6e
    vmem_limit = cap * 7 // 8    # compiler cap, leaves headroom vs physical
    return tile_budget, vmem_limit


def _tile_bytes(block_b, block_s, H, itemsize):
    """Rough upper bound on VMEM needed for one pipelined grid step."""
    lstm_io = 2 * block_b * block_s * H * itemsize        # double-buffered lstm
    small_io = 2 * 2 * block_b * H * itemsize             # hid + out, 2-buffered
    f32_work = block_b * (block_s * H + 4 * block_s + 4 * H) * 4
    return lstm_io + small_io + f32_work


def _batch_tile_candidates(B):
    """Multiple-of-8 tiles dividing B (largest first), then full-B fallback."""
    cands = [c for c in range(8 * (B // 8), 0, -8) if B % c == 0]
    if B >= 16:
        # Guarantee >= 2 grid steps so ("parallel",) shards across both
        # TensorCores on v7x (harmless on single-TC v5e/v6e).
        capped = [c for c in cands if c <= B // 2]
        cands = capped if capped else cands
    if B not in cands:
        cands.append(B)  # block == full array dim is always layout-legal
    return cands


def _seq_tile_candidates(S):
    cands = [c for c in range(8 * (S // 8), 0, -8) if S % c == 0]
    if S not in cands:
        cands.append(S)
    return cands


def _choose_tiles(B, S, H, itemsize, budget):
    batch_cands = _batch_tile_candidates(B)
    # Prefer the single-pass kernel (block_s == S) with the largest batch tile
    # that fits the VMEM budget.
    for bb in batch_cands:
        if _tile_bytes(bb, S, H, itemsize) <= budget:
            return bb, S
    # Even the smallest batch tile cannot hold the full sequence: switch to
    # the S-tiled online-softmax kernel with the largest sequence tile that fits.
    bb = min(batch_cands)
    seq_cands = _seq_tile_candidates(S)
    for ss in seq_cands:
        if _tile_bytes(bb, ss, H, itemsize) <= budget:
            return bb, ss
    return bb, min(seq_cands)  # last resort


# ----------------------------------------------------------------------------
# Wrapper
# ----------------------------------------------------------------------------

def attention_forward(lstm_output, final_state, *, block_b=None, block_s=None):
    """lstm_output: (B, S, H); final_state: (1, B, H) -> (B, H).

    Inputs may be f32 or bf16; softmax math is always f32 internally.
    """
    B, S, H = lstm_output.shape
    itemsize = jnp.dtype(lstm_output.dtype).itemsize
    tile_budget, vmem_limit = _vmem_budgets()

    auto_bb, auto_ss = _choose_tiles(B, S, H, itemsize, tile_budget)
    if block_b is None:
        block_b = auto_bb
    if block_s is None:
        block_s = auto_ss
    if B % block_b != 0:
        block_b = B
    if S % block_s != 0:
        block_s = S

    # (1, B, H) -> (B, H): unit-dim drop, metadata-only (no copy).
    hidden = jnp.reshape(final_state, (B, H))

    if block_s == S:
        out = pl.pallas_call(
            _attention_kernel,
            out_shape=jax.ShapeDtypeStruct((B, H), lstm_output.dtype),
            grid_spec=pltpu.PrefetchScalarGridSpec(
                num_scalar_prefetch=0,
                grid=(B // block_b,),
                in_specs=[
                    pl.BlockSpec((block_b, S, H), lambda b: (b, 0, 0)),
                    pl.BlockSpec((block_b, H), lambda b: (b, 0)),
                ],
                out_specs=pl.BlockSpec((block_b, H), lambda b: (b, 0)),
            ),
            compiler_params=pltpu.CompilerParams(
                dimension_semantics=("parallel",),
                vmem_limit_bytes=int(vmem_limit),
            ),
        )(lstm_output, hidden)
    else:
        out = pl.pallas_call(
            _attention_kernel_s_tiled,
            out_shape=jax.ShapeDtypeStruct((B, H), lstm_output.dtype),
            grid_spec=pltpu.PrefetchScalarGridSpec(
                num_scalar_prefetch=0,
                grid=(B // block_b, S // block_s),
                in_specs=[
                    pl.BlockSpec((block_b, block_s, H), lambda b, s: (b, s, 0)),
                    pl.BlockSpec((block_b, H), lambda b, s: (b, 0)),
                ],
                out_specs=pl.BlockSpec((block_b, H), lambda b, s: (b, 0)),
                scratch_shapes=[
                    pltpu.VMEM((block_b, 1), jnp.float32),  # running max m
                    pltpu.VMEM((block_b, 1), jnp.float32),  # running denom l
                    pltpu.VMEM((block_b, H), jnp.float32),  # running numerator
                ],
            ),
            compiler_params=pltpu.CompilerParams(
                dimension_semantics=("parallel", "arbitrary"),
                vmem_limit_bytes=int(vmem_limit),
            ),
        )(lstm_output, hidden)

    return out


# ----------------------------------------------------------------------------
# Pure-JAX reference (matches the PyTorch forward)
# ----------------------------------------------------------------------------

def _reference(lstm_output, final_state):
    hidden = jnp.squeeze(final_state, axis=0)                 # (B, H)
    attn = jnp.einsum("bsh,bh->bs", lstm_output, hidden)      # (B, S)
    soft = jax.nn.softmax(attn, axis=1)                       # (B, S)
    return jnp.einsum("bsh,bs->bh", lstm_output, soft)        # (B, H)


if __name__ == "__main__":
    # Small shapes consistent with the module: batch=2, seq=8, hidden=32.
    B, S, H = 2, 8, 32
    attention_size = H
    # Defined in __init__ but unused in the PyTorch forward -> not applied.
    _unused_scale = 1.0 / math.sqrt(attention_size)

    key = jax.random.PRNGKey(0)
    k1, k2, k3, k4 = jax.random.split(key, 4)
    lstm_output = jax.random.normal(k1, (B, S, H), dtype=jnp.float32)
    final_state = jax.random.normal(k2, (1, B, H), dtype=jnp.float32)

    out = jax.block_until_ready(attention_forward(lstm_output, final_state))
    ref = _reference(lstm_output, final_state)
    assert out.shape == (B, H)
    assert jnp.allclose(out, ref, atol=1e-4, rtol=1e-4), "mismatch vs reference"

    # Also exercise the online-softmax (S-tiled) path at small scale by
    # forcing the tile sizes (it auto-triggers only when a full (TB, S, H)
    # slab exceeds the per-core VMEM budget).
    Bt, St, Ht = 16, 64, 128
    lstm2 = jax.random.normal(k3, (Bt, St, Ht), dtype=jnp.float32)
    fin2 = jax.random.normal(k4, (1, Bt, Ht), dtype=jnp.float32)
    out2 = jax.block_until_ready(
        attention_forward(lstm2, fin2, block_b=8, block_s=16))
    ref2 = _reference(lstm2, fin2)
    assert out2.shape == (Bt, Ht)
    assert jnp.allclose(out2, ref2, atol=1e-4, rtol=1e-4), "mismatch (S-tiled)"

    print("KERNEL_OK")
</pallas_src>

<mosaic_0001>
module attributes {stable_mosaic.version = 11 : i64} {
  func.func @_attention_kernel(%arg0: i32, %arg1: memref<2x8x32xf32, #tpu.memory_space<vmem>>, %arg2: memref<2x32xf32, #tpu.memory_space<vmem>>, %arg3: memref<2x32xf32, #tpu.memory_space<vmem>>) attributes {dimension_semantics = [#tpu.dimension_semantics<parallel>], iteration_bounds = array<i64: 1>, scalar_prefetch = 0 : i64, scratch_operands = 0 : i64, tpu.core_type = #tpu.core_type<tc>, window_params = [{transform_indices = @transform_0, window_bounds = array<i64: 2, 8, 32>}, {transform_indices = @transform_1, window_bounds = array<i64: 2, 32>}, {transform_indices = @transform_2, window_bounds = array<i64: 2, 32>}]} {
    %c0 = arith.constant 0 : index
    %c0_0 = arith.constant 0 : index
    %c0_1 = arith.constant 0 : index
    %0 = vector.load %arg1[%c0, %c0_0, %c0_1] : memref<2x8x32xf32, #tpu.memory_space<vmem>>, vector<2x8x32xf32>
    %c0_2 = arith.constant 0 : index
    %c0_3 = arith.constant 0 : index
    %1 = vector.load %arg2[%c0_2, %c0_3] : memref<2x32xf32, #tpu.memory_space<vmem>>, vector<2x32xf32>
    %2 = vector.shape_cast %1 : vector<2x32xf32> to vector<2x1x32xf32>
    %3 = vector.broadcast %2 : vector<2x1x32xf32> to vector<2x8x32xf32>
    %4 = arith.mulf %0, %3 : vector<2x8x32xf32>
    %cst = arith.constant dense<0.000000e+00> : vector<2x8xf32>
    %5 = vector.multi_reduction <add>, %4, %cst [2] : vector<2x8x32xf32> to vector<2x8xf32>
    %cst_4 = arith.constant dense<0xFF800000> : vector<2xf32>
    %6 = vector.multi_reduction <maximumf>, %5, %cst_4 [1] : vector<2x8xf32> to vector<2xf32>
    %7 = vector.shape_cast %6 : vector<2xf32> to vector<2x1xf32>
    %8 = vector.broadcast %7 : vector<2x1xf32> to vector<2x8xf32>
    %9 = arith.subf %5, %8 : vector<2x8xf32>
    %10 = math.exp %9 : vector<2x8xf32>
    %cst_5 = arith.constant dense<0.000000e+00> : vector<2xf32>
    %11 = vector.multi_reduction <add>, %10, %cst_5 [1] : vector<2x8xf32> to vector<2xf32>
    %12 = vector.shape_cast %11 : vector<2xf32> to vector<2x1xf32>
    %13 = vector.broadcast %12 : vector<2x1xf32> to vector<2x8xf32>
    %14 = arith.divf %10, %13 : vector<2x8xf32>
    %15 = vector.shape_cast %14 : vector<2x8xf32> to vector<2x8x1xf32>
    %16 = vector.broadcast %15 : vector<2x8x1xf32> to vector<2x8x32xf32>
    %17 = arith.mulf %16, %0 : vector<2x8x32xf32>
    %cst_6 = arith.constant dense<0.000000e+00> : vector<2x32xf32>
    %18 = vector.multi_reduction <add>, %17, %cst_6 [1] : vector<2x8x32xf32> to vector<2x32xf32>
    %c0_7 = arith.constant 0 : index
    %c0_8 = arith.constant 0 : index
    %19 = vector.load %arg3[%c0_7, %c0_8] : memref<2x32xf32, #tpu.memory_space<vmem>>, vector<2x32xf32>
    tpu.vector_store %arg3[%c0_7, %c0_8], %18 {strides = array<i32>} : memref<2x32xf32, #tpu.memory_space<vmem>>, vector<2x32xf32>,
    return
  }
  func.func @transform_0(%arg0: i32) -> (i32, i32, i32) {
    %c0_i32 = arith.constant 0 : i32
    %c0_i32_0 = arith.constant 0 : i32
    %c0_i32_1 = arith.constant 0 : i32
    return %arg0, %c0_i32, %c0_i32_0 : i32, i32, i32
  }
  func.func @transform_1(%arg0: i32) -> (i32, i32) {
    %c0_i32 = arith.constant 0 : i32
    %c0_i32_0 = arith.constant 0 : i32
    return %arg0, %c0_i32 : i32, i32
  }
  func.func @transform_2(%arg0: i32) -> (i32, i32) {
    %c0_i32 = arith.constant 0 : i32
    %c0_i32_0 = arith.constant 0 : i32
    return %arg0, %c0_i32 : i32, i32
  }
}

</mosaic_0001>

<bundles_post_ra>
// kernel: tpu_custom_call.1
= control target key start
LH: loop header
LB: loop body
LE: loop exit
PB: predicated region body
PF: predicated region fallthrough
CT: control target
= control target key end

     0   :  { %7 = vsyncpa [#allocation3], 0  ;;  %s312_s0 = inlined_call_operand.hbm [shape: f32[2,8,32], index: 0, kind: input, shape index: {}]   ;;  %s313_s1 = inlined_call_operand.vmem [shape: f32[2,32], index: 1, kind: input, shape index: {}]   ;;  %s314_s2 = inlined_call_operand.hbm [shape: f32[2,32], index: 2, kind: output, shape index: {}]  }
   0x1   :  { %8 = vsyncpa [#allocation4], 0  ;;  %s255_s9 = smov [#allocation2]   ;;  %s207_s13 = scalar_lea.hbm %s312_s0, 256 }
   0x2   :  { %s14_s10 = sshll.u32 %s255_s9, 4  ;;  %p208_p0 = scmp.ne.s32.totalorder %s312_s0, %s207_s13  ;;  %s15_s10 = int_to_ptr.vmem [resolvable:$true] %s14_s10 }
   0x3   :  { %p211_p1 = scmp.lt.u32.totalorder %s207_s13, %s312_s0 }
   0x5   :  { %p213_p2 = pnand %p211_p1, %p208_p0 }
   0x7   :  { %216 = shalt.err (!%p213_p2)
}
   0x8   :  { %s217_s18 = scalar_lea.vmem %s15_s10, 256  ;;  %p222_p4 = scmp.lt.s32.totalorder %s15_s10, %s15_s10 }
   0x9   :  { %p218_p3 = scmp.ne.s32.totalorder %s15_s10, %s217_s18  ;;  %p223_p5 = scmp.lt.s32.totalorder %s217_s18, %s217_s18 }
   0xb   :  { %p224_p6 = por %p223_p5, %p222_p4 }
   0xd   :  { %p225_p7 = pnand %p224_p6, %p218_p3 }
   0xf   :  { %228 = shalt.err (!%p225_p7)
}
  0x10   :  { %s256_s19 = smov 128   ;;  %s257_s20 = smov 8  }
  0x11   :  { %20 = dma.hbm_to_vmem [thread:$0]  %s312_s0, 256, %s15_s10, [#allocation3], %s256_s19, %s256_s19, %s257_s20  }
  0x12   :  { %251 = dma.done.wait [#allocation3], 256  }
  0x13   :  { %252 = vsyncadd [#allocation3], 4294967040  ;;  %v41_v0 = vlaneseq  ;;  %v258_v1 = vmov 1966171168   ;;  %v26_v12 = vld [vmem:[#allocation2] sm:$0xff]  ;;  %vm64_vm0 = vcmask 261120  }
  0x14   :  { %v39_v2 = vunpack.c.l.s4 %v258_v1  ;;  %v190_v9 = vld.sshfl [vmem:[%s313_s1] sm:$0x11 pattern:$0x75316420]  ;;  %v27_v15 = vld [vmem:[#allocation2 + $0x8] sm:$0xff]  ;;  %vm83_vm1 = vcmask 1041409  }
  0x15   :  { %v42_v3 = vshrl.u32 %v41_v0, 7  ;;  %v74_v4 = vand.u32 127, %v41_v0  ;;  %v37_v10 = vcombine.high %v190_v9, %v190_v9  ;;  %vm86_vm2 = vcmask 58368   ;;  %s260_s0 = smov [#allocation5]  }
  0x16   :  { %v40_v5 = vunpack.c.0.s8 %v39_v2  ;;  %v259_v27 = vmov 0   ;;  %s181_s1 = sshll.u32 %s260_s0, 4  ;;  %vm173_vm3 = vcmask 254976   ;;  %s182_s1 = int_to_ptr.vmem [resolvable:$true] %s181_s1 }
  0x17   :  { %v77_v6 = vsub.s32 %v74_v4, %v42_v3  ;;  %v54_v8 = vsub.s32 0, %v42_v3  ;;  %198 = vset.pattern.permute.xlu0 %v259_v27  ;;  %197 = vset.pattern.permute.xlu1 %v259_v27  ;;  %v97_v28 = vsub.s32 1, %v42_v3  ;;  %s229_s25 = scalar_lea.vmem %s182_s1, 32  ;;  %p234_p9 = scmp.lt.s32.totalorder %s182_s1, %s182_s1 }
  0x18   :  { %v43_v7 = vsub.s32 %v40_v5, %v42_v3  ;;  %p230_p8 = scmp.ne.s32.totalorder %s182_s1, %s229_s25  ;;  %p235_p10 = scmp.lt.s32.totalorder %s229_s25, %s229_s25 }
  0x1a   :  { %v44_v11 = vrot.slane %v190_v9, %v43_v7  ;;  %v51_v14 = vrot.slane %v37_v10, %v43_v7  ;;  %p236_p11 = por %p235_p10, %p234_p9 }
  0x1c   :  { %v55_v13 = vrot.slane %v44_v11, %v54_v8  ;;  %v59_v17 = vrot.slane %v51_v14, %v54_v8  ;;  %p237_p12 = pnand %p236_p11, %p230_p8 }
  0x1e   :  { %v62_v16 = vmul.f32 %v55_v13, %v26_v12  ;;  %v63_v19 = vmul.f32 %v59_v17, %v27_v15 }
  0x20   :  { %v65_v18 = vsel %vm64_vm0, %v62_v16, 0.0  ;;  %v68_v20 = vsel %vm64_vm0, %v63_v19, 0.0 }
  0x21   :  { %66 = vadd.xlane.f32.xlu0 %v65_v18 }
  0x25   :  { %69 = vadd.xlane.f32.xlu0 %v68_v20 }
  0xae   :  { %v67_v21 = vpop.xlane.xlu0 %66 }
  0xaf   :  { %v78_v23 = vrot.slane %v67_v21, %v77_v6 }
  0xb2   :  { %v70_v22 = vpop.xlane.xlu0 %69 }
  0xb3   :  { %v82_v24 = vrot.slane %v70_v22, %v77_v6 }
  0xb5   :  { %v84_v25 = vsel %vm83_vm1, %v82_v24, %v78_v23 }
  0xb6   :  { %v87_v26 = vsel %vm86_vm2, %v84_v25, -inf }
  0xb7   :  { %88 = vmax.xlane.f32.xlu1 %v87_v26 }
 0x144   :  { %v89_v29 = vpop.xlane.xlu1 %88 }
 0x145   :  { %v94_v30 = vrot.slane %v89_v29, %v54_v8  ;;  %v98_v31 = vrot.slane %v89_v29, %v97_v28 }
 0x147   :  { %v101_v32 = vsub.f32 %v67_v21, %v94_v30  ;;  %v102_v33 = vsub.f32 %v70_v22, %v98_v31 }
 0x149   :  { %v103_v34 = vmul.f32 1.442695, %v101_v32  ;;  %v105_v35 = vmul.f32 1.442695, %v102_v33 }
 0x14b   :  { %199 = vpow2.f32 %v103_v34 }
 0x14c   :  { %201 = vpow2.f32 %v105_v35 }
 0x155   :  { %v200_v36 = vpop.eup %199 }
 0x156   :  { %v202_v37 = vpop.eup %201  ;;  %110 = vperm.xlu1 %197, %v200_v36  }
 0x157   :  { %113 = vperm.xlu0 %198, %v202_v37  }
 0x1d5   :  { %v111_v38 = vpop.permute.xlu1 %110 }
 0x1d6   :  { %v114_v39 = vpop.permute.xlu0 %113  ;;  %v118_v40 = vrot.slane %v111_v38, %v77_v6 }
 0x1d7   :  { %v122_v41 = vrot.slane %v114_v39, %v77_v6 }
 0x1d9   :  { %v123_v42 = vsel %vm83_vm1, %v122_v41, %v118_v40 }
 0x1da   :  { %v125_v43 = vsel %vm86_vm2, %v123_v42, 0.0 }
 0x1db   :  { %126 = vadd.xlane.f32.xlu1 %v125_v43 }
 0x268   :  { %v127_v44 = vpop.xlane.xlu1 %126 }
 0x269   :  { %v132_v45 = vrot.slane %v127_v44, %v54_v8  ;;  %v136_v46 = vrot.slane %v127_v44, %v97_v28 }
 0x26b   :  { %203 = vrcp.f32 %v132_v45 }
 0x26c   :  { %205 = vrcp.f32 %v136_v46 }
 0x275   :  { %v204_v47 = vpop.eup %203 }
 0x276   :  { %v140_v48 = vmul.f32 %v204_v47, %v200_v36  ;;  %v206_v49 = vpop.eup %205 }
 0x277   :  { %v142_v50 = vmul.f32 %v206_v49, %v202_v37 }
 0x278   :  { %145 = vperm.xlu0 %198, %v140_v48  }
 0x27c   :  { %150 = vperm.xlu0 %198, %v142_v50  }
 0x2f7   :  { %v146_v51 = vpop.permute.xlu0 %145 }
 0x2f8   :  { %v153_v52 = vmul.f32 %v146_v51, %v26_v12 }
 0x2fa   :  { %v155_v53 = vsel %vm64_vm0, %v153_v52, 0.0 }
 0x2fb   :  { %v156_v54 = vrot.slane %v155_v53, 4  ;;  %v151_v55 = vpop.permute.xlu0 %150 }
 0x2fc   :  { %v154_v56 = vmul.f32 %v151_v55, %v27_v15 }
 0x2fd   :  { %v157_v57 = vadd.f32 %v156_v54, %v155_v53 }
 0x2fe   :  { %v162_v58 = vsel %vm64_vm0, %v154_v56, 0.0 }
 0x2ff   :  { %v158_v59 = vrot.slane %v157_v57, 2  ;;  %v163_v60 = vrot.slane %v162_v58, 4 }
 0x301   :  { %v159_v61 = vadd.f32 %v158_v59, %v157_v57  ;;  %v164_v62 = vadd.f32 %v163_v60, %v162_v58 }
 0x303   :  { %v165_v63 = vrot.slane %v164_v62, 2  ;;  %v160_v0 = vrot.slane %v159_v61, 1 }
 0x305   :  { %v166_v1 = vadd.f32 %v165_v63, %v164_v62  ;;  %v161_v3 = vadd.f32 %v160_v0, %v159_v61 }
 0x307   :  { %v167_v2 = vrot.slane %v166_v1, 1 }
 0x309   :  { %v168_v4 = vadd.f32 %v167_v2, %v166_v1 }
 0x30b   :  { %v171_v5 = vsel %vm83_vm1, %v168_v4, %v161_v3 }
 0x30c   :  { %174 = vst.msk [vmem:[#allocation5] sm:$0x3] %vm173_vm3, %v171_v5 }
 0x30d   :  { %240 = shalt.err (!%p237_p12)
}
 0x30e   :  { %s241_s28 = scalar_lea.hbm %s314_s2, 32 }
 0x30f   :  { %p242_p13 = scmp.ne.s32.totalorder %s314_s2, %s241_s28  ;;  %p245_p0 = scmp.lt.u32.totalorder %s241_s28, %s314_s2 }
 0x311   :  { %p247_p1 = pnand %p245_p0, %p242_p13 }
 0x313   :  { %250 = shalt.err (!%p247_p1)
}
 0x314   :  { %184 = dma.vmem_to_hbm [thread:$0]  %s182_s1, 32, %s314_s2, [#allocation4]  }
 0x315   :  { %253 = dma.done.wait [#allocation4], 32  }
 0x316   :  { %254 = vsyncadd [#allocation4], 4294967264 }
 0x317   :  { %188 = vsyncpa [#allocation3], 1 }
 0x318   :  { %189 = vsyncpa [#allocation4], 1 }

</bundles_post_ra>
